<compile_context>
chip_gen: v5e
topology: v5e:2x2
jax: 0.10.0
libtpu: 0.0.40
codegen_flags: <defaults>
</compile_context>

<pallas_src>
import functools

import jax
import jax.numpy as jnp
from jax import lax
from jax.experimental import pallas as pl
from jax.experimental.pallas import tpu as pltpu


def _round_up(x, m):
    return (x + m - 1) // m * m


def _dict_bn_kernel(n_ref, x_ref, g_ref, b_ref, o_ref, *, eps):
    """One grid step == one dict entry.

    n_ref : SMEM int32[K]        true (unpadded) row count per key
    x_ref : VMEM [1, N_max, H_p] zero-padded node features of this key
    g_ref : VMEM [1, H_p]        gamma (f32, shared across keys)
    b_ref : VMEM [1, H_p]        beta  (f32, shared across keys)
    o_ref : VMEM [1, N_max, H_p] normalized output
    """
    k = pl.program_id(0)
    inv_n = 1.0 / n_ref[k].astype(jnp.float32)

    x = x_ref[0].astype(jnp.float32)                      # [N_max, H_p]

    # Padded rows are zero, so they contribute nothing to sum / sumsq; only the
    # true row count matters for the divisors.  Single pass over x.
    s = jnp.sum(x, axis=0, keepdims=True)                 # [1, H_p]
    ss = jnp.sum(x * x, axis=0, keepdims=True)            # [1, H_p]
    mean = s * inv_n
    var = ss * inv_n - mean * mean                        # biased variance
    inv_std = lax.rsqrt(var + eps)                        # EUP slot (free-ish)

    # Fold the affine: y = x * a + b  (2 VALU ops per element).
    a = inv_std * g_ref[...]                              # [1, H_p]
    b = b_ref[...] - mean * a                             # [1, H_p]
    o_ref[0] = (x * a + b).astype(o_ref.dtype)


def dict_batch_norm_pallas(x_dict, gamma, beta, *, eps=1e-5):
    """DictBatchNorm.forward: shared BatchNorm applied to every dict value."""
    keys = list(x_dict.keys())
    vals = [x_dict[k] for k in keys]
    K = len(keys)
    H = gamma.shape[-1]
    out_dtype = vals[0].dtype

    n_rows = [int(v.shape[0]) for v in vals]
    # Lane-dense feature axis (multiple of 128) and sublane-aligned row axis.
    H_pad = _round_up(H, 128)
    N_max = _round_up(max(n_rows), 8)

    # Zero-pad every entry to a common [N_max, H_pad] tile; stack -> [K, N_max, H_pad].
    stacked = jnp.stack(
        [jnp.pad(v, ((0, N_max - v.shape[0]), (0, H_pad - H))) for v in vals]
    )
    counts = jnp.asarray(n_rows, dtype=jnp.int32)

    # Affine params: hoisted once, kept in f32, padded to the lane-dense width.
    g = jnp.pad(gamma.astype(jnp.float32).reshape(1, H), ((0, 0), (0, H_pad - H)))
    b = jnp.pad(beta.astype(jnp.float32).reshape(1, H), ((0, 0), (0, H_pad - H)))

    kernel = functools.partial(_dict_bn_kernel, eps=eps)
    out = pl.pallas_call(
        kernel,
        out_shape=jax.ShapeDtypeStruct((K, N_max, H_pad), out_dtype),
        grid_spec=pltpu.PrefetchScalarGridSpec(
            num_scalar_prefetch=1,               # row counts -> SMEM
            grid=(K,),
            in_specs=[
                pl.BlockSpec((1, N_max, H_pad), lambda k, n_ref: (k, 0, 0)),
                pl.BlockSpec((1, H_pad), lambda k, n_ref: (0, 0)),
                pl.BlockSpec((1, H_pad), lambda k, n_ref: (0, 0)),
            ],
            out_specs=pl.BlockSpec((1, N_max, H_pad), lambda k, n_ref: (k, 0, 0)),
        ),
        compiler_params=pltpu.CompilerParams(
            dimension_semantics=("parallel",),   # v7x: split keys across 2 TCs
        ),
    )(counts, stacked, g, b)

    return {k: out[i, : n_rows[i], :H] for i, k in enumerate(keys)}


def _reference_batchnorm(x, gamma, beta, eps=1e-5):
    x32 = x.astype(jnp.float32)
    mean = jnp.mean(x32, axis=0, keepdims=True)
    var = jnp.mean((x32 - mean) ** 2, axis=0, keepdims=True)
    return ((x32 - mean) / jnp.sqrt(var + eps) * gamma.reshape(1, -1)
            + beta.reshape(1, -1)).astype(x.dtype)


if __name__ == "__main__":
    hidden_dim = 32
    key = jax.random.PRNGKey(0)
    k_u, k_r, k_i, k_g, k_b = jax.random.split(key, 5)

    # Heterogeneous-graph-style node-feature dict, each value [N_nodes, hidden_dim].
    x_dict = {
        "user": jax.random.normal(k_u, (16, hidden_dim), dtype=jnp.float32),
        "recipe": jax.random.normal(k_r, (8, hidden_dim), dtype=jnp.float32),
        "ingredient": jax.random.normal(k_i, (24, hidden_dim), dtype=jnp.float32),
    }

    # BatchNorm affine parameters (small random values so the affine path is exercised).
    gamma = 1.0 + 0.1 * jax.random.normal(k_g, (hidden_dim,), dtype=jnp.float32)
    beta = 0.1 * jax.random.normal(k_b, (hidden_dim,), dtype=jnp.float32)

    out_dict = dict_batch_norm_pallas(x_dict, gamma, beta)
    out_dict = jax.tree_util.tree_map(jax.block_until_ready, out_dict)

    # Sanity check against a pure-JAX reference of nn.BatchNorm1d training forward.
    for k, v in x_dict.items():
        ref = _reference_batchnorm(v, gamma, beta)
        if out_dict[k].shape != ref.shape:
            raise AssertionError(f"shape mismatch for key {k}")
        if not jnp.allclose(out_dict[k], ref, atol=1e-4, rtol=1e-4):
            raise AssertionError(f"value mismatch for key {k}")

    print("KERNEL_OK")
</pallas_src>

<mosaic_0001>
module attributes {stable_mosaic.version = 11 : i64} {
  func.func @_dict_bn_kernel(%arg0: i32, %arg1: memref<3xi32, #tpu.memory_space<smem>>, %arg2: memref<1x24x128xf32, #tpu.memory_space<vmem>>, %arg3: memref<1x128xf32, #tpu.memory_space<vmem>>, %arg4: memref<1x128xf32, #tpu.memory_space<vmem>>, %arg5: memref<1x24x128xf32, #tpu.memory_space<vmem>>) attributes {dimension_semantics = [#tpu.dimension_semantics<parallel>], iteration_bounds = array<i64: 3>, scalar_prefetch = 1 : i64, scratch_operands = 0 : i64, tpu.core_type = #tpu.core_type<tc>, window_params = [{transform_indices = @transform_0, window_bounds = array<i64: 1, 24, 128>}, {pipeline_mode = #tpu.pipeline_mode<synchronous>, transform_indices = @transform_1, window_bounds = array<i64: 1, 128>}, {pipeline_mode = #tpu.pipeline_mode<synchronous>, transform_indices = @transform_2, window_bounds = array<i64: 1, 128>}, {transform_indices = @transform_3, window_bounds = array<i64: 1, 24, 128>}]} {
    %0 = arith.index_cast %arg0 : i32 to index
    %1 = memref.load %arg1[%0] : memref<3xi32, #tpu.memory_space<smem>>
    %2 = arith.sitofp %1 : i32 to f32
    %cst = arith.constant 1.000000e+00 : f32
    %3 = arith.divf %cst, %2 : f32
    %c0 = arith.constant 0 : index
    %c0_0 = arith.constant 0 : index
    %c0_1 = arith.constant 0 : index
    %4 = vector.load %arg2[%c0, %c0_0, %c0_1] : memref<1x24x128xf32, #tpu.memory_space<vmem>>, vector<1x24x128xf32>
    %5 = vector.shape_cast %4 : vector<1x24x128xf32> to vector<24x128xf32>
    %cst_2 = arith.constant dense<0.000000e+00> : vector<128xf32>
    %6 = vector.multi_reduction <add>, %5, %cst_2 [0] : vector<24x128xf32> to vector<128xf32>
    %7 = vector.shape_cast %6 : vector<128xf32> to vector<1x128xf32>
    %8 = arith.mulf %5, %5 : vector<24x128xf32>
    %cst_3 = arith.constant dense<0.000000e+00> : vector<128xf32>
    %9 = vector.multi_reduction <add>, %8, %cst_3 [0] : vector<24x128xf32> to vector<128xf32>
    %10 = vector.shape_cast %9 : vector<128xf32> to vector<1x128xf32>
    %11 = vector.broadcast %3 : f32 to vector<1x128xf32>
    %12 = arith.mulf %7, %11 : vector<1x128xf32>
    %13 = vector.broadcast %3 : f32 to vector<1x128xf32>
    %14 = arith.mulf %10, %13 : vector<1x128xf32>
    %15 = arith.mulf %12, %12 : vector<1x128xf32>
    %16 = arith.subf %14, %15 : vector<1x128xf32>
    %cst_4 = arith.constant 9.99999974E-6 : f32
    %17 = vector.broadcast %cst_4 : f32 to vector<1x128xf32>
    %18 = arith.addf %16, %17 : vector<1x128xf32>
    %19 = math.rsqrt %18 : vector<1x128xf32>
    %c0_5 = arith.constant 0 : index
    %c0_6 = arith.constant 0 : index
    %20 = vector.load %arg3[%c0_5, %c0_6] : memref<1x128xf32, #tpu.memory_space<vmem>>, vector<1x128xf32>
    %21 = arith.mulf %19, %20 : vector<1x128xf32>
    %c0_7 = arith.constant 0 : index
    %c0_8 = arith.constant 0 : index
    %22 = vector.load %arg4[%c0_7, %c0_8] : memref<1x128xf32, #tpu.memory_space<vmem>>, vector<1x128xf32>
    %23 = arith.mulf %12, %21 : vector<1x128xf32>
    %24 = arith.subf %22, %23 : vector<1x128xf32>
    %25 = vector.broadcast %21 : vector<1x128xf32> to vector<24x128xf32>
    %26 = arith.mulf %5, %25 : vector<24x128xf32>
    %27 = vector.broadcast %24 : vector<1x128xf32> to vector<24x128xf32>
    %28 = arith.addf %26, %27 : vector<24x128xf32>
    %c0_9 = arith.constant 0 : index
    %c0_10 = arith.constant 0 : index
    %c0_11 = arith.constant 0 : index
    %29 = vector.load %arg5[%c0_9, %c0_10, %c0_11] : memref<1x24x128xf32, #tpu.memory_space<vmem>>, vector<1x24x128xf32>
    %30 = vector.shape_cast %29 : vector<1x24x128xf32> to vector<24x128xf32>
    %31 = vector.shape_cast %28 : vector<24x128xf32> to vector<1x24x128xf32>
    tpu.vector_store %arg5[%c0_9, %c0_10, %c0_11], %31 {strides = array<i32>} : memref<1x24x128xf32, #tpu.memory_space<vmem>>, vector<1x24x128xf32>,
    return
  }
  func.func @transform_0(%arg0: i32, %arg1: memref<3xi32, #tpu.memory_space<smem>>) -> (i32, i32, i32) {
    %c0_i32 = arith.constant 0 : i32
    %c0_i32_0 = arith.constant 0 : i32
    %c0_i32_1 = arith.constant 0 : i32
    return %arg0, %c0_i32, %c0_i32_0 : i32, i32, i32
  }
  func.func @transform_1(%arg0: i32, %arg1: memref<3xi32, #tpu.memory_space<smem>>) -> (i32, i32) {
    %c0_i32 = arith.constant 0 : i32
    %c0_i32_0 = arith.constant 0 : i32
    %c0_i32_1 = arith.constant 0 : i32
    return %c0_i32, %c0_i32_0 : i32, i32
  }
  func.func @transform_2(%arg0: i32, %arg1: memref<3xi32, #tpu.memory_space<smem>>) -> (i32, i32) {
    %c0_i32 = arith.constant 0 : i32
    %c0_i32_0 = arith.constant 0 : i32
    %c0_i32_1 = arith.constant 0 : i32
    return %c0_i32, %c0_i32_0 : i32, i32
  }
  func.func @transform_3(%arg0: i32, %arg1: memref<3xi32, #tpu.memory_space<smem>>) -> (i32, i32, i32) {
    %c0_i32 = arith.constant 0 : i32
    %c0_i32_0 = arith.constant 0 : i32
    %c0_i32_1 = arith.constant 0 : i32
    return %arg0, %c0_i32, %c0_i32_0 : i32, i32, i32
  }
}

</mosaic_0001>

<bundles_post_ra>
// kernel: tpu_custom_call.1
= control target key start
LH: loop header
LB: loop body
LE: loop exit
PB: predicated region body
PF: predicated region fallthrough
CT: control target
= control target key end

     0   :  { %s544_s18 = smov [#allocation3]   ;;  %s703_s0 = inlined_call_operand.hbm [shape: s32[3], index: 0, kind: input, shape index: {}]   ;;  %s704_s1 = inlined_call_operand.hbm [shape: f32[3,24,128], index: 1, kind: input, shape index: {}]   ;;  %s705_s2 = inlined_call_operand.vmem [shape: f32[1,128], index: 2, kind: input, shape index: {}]   ;;  %s706_s3 = inlined_call_operand.vmem [shape: f32[1,128], index: 3, kind: input, shape index: {}]   ;;  %s707_s4 = inlined_call_operand.hbm [shape: f32[3,24,128], index: 4, kind: output, shape index: {}]  }
   0x1   :  { %s10_s17 = sshll.u32 %s703_s0, 4  ;;  %s11_s17 = int_to_ptr.hbm [resolvable:$true] %s10_s17 }
   0x2   :  { %13 = dma.hbm_to_smem %s11_s17, 16, %s544_s18, [#allocation2] }
   0x3   :  { %518 = dma.done.wait [#allocation2], 16 }
   0x4   :  { %519 = vsyncadd [#allocation2], 4294967280 }
   0x5   :  { %16 = sfence }
   0x6   :  { %17 = vsyncpa [#allocation5], 0 }
   0x7   :  { %19 = vsyncpa [#allocation5 + $0x1], 0 }
   0x8   :  { %20 = vsyncpa [#allocation6], 0 }
   0x9   :  { %22 = vsyncpa [#allocation6 + $0x1], 0  ;;  %s577_s19 = smov 0   ;;  %s579_s20 = smov 0  }
   0xa   :  { %s581_s21 = smov 0   ;;  %s583_s22 = smov 0  }
   0xb LB: > { %s598_s0 = sadd.s32 4294967295, %s542_s22   ;;  %s363_s23 = sadd.s32 4294967294, %s542_s22   ;;  %s542_s22 = sphi %s583_s22, %s715_s22   ;;  %s538_s21 = sphi %s581_s21, %s714_s21   ;;  %s534_s20 = sphi %s579_s20, %s713_s20   ;;  %s530_s19 = sphi %s577_s19, %s712_s19  }
   0xc   : > { %s602_s24 = sadd.s32 1, %s542_s22   ;;  %s35_s25 = sadd.s32 1, %s538_s21 }
   0xd   : > { %s32_s26 = ssub.s32 %s542_s22, %s602_s24  ;;  %p42_p0 = scmp.ne.s32.totalorder %s538_s21, %s534_s20 }
   0xe   : > { %p33_p1 = scmp.eq.s32.totalorder %s32_s26, 0  ;;  %p43_p2 = scmp.eq.s32.totalorder %s542_s22, 0 }
   0xf   : > { %p48_p3 = scmp.ne.s32.totalorder %s534_s20, %s530_s19  ;;  %p49_p4 = scmp.eq.s32.totalorder %s598_s0, 0 }
  0x10   : > { %s614_s27 = scalar_select %p33_p1, %s538_s21, %s35_s25  }
  0x11   : > { %p44_p5 = por %p43_p2, %p42_p0  ;;  %p616_p6 = por %p49_p4, %p48_p3 }
  0x12   : > { %p114_p7 = scmp.eq.s32.totalorder %s598_s0, 2  ;;  %p120_p8 = scmp.eq.s32.totalorder %s363_s23, 2 }
  0x13   : > { %p389_p9 = scmp.lt.s32.totalorder %s542_s22, 3  ;;  %s146_s5 = sand.u32 1, %s538_s21  }
  0x14   : > { %p622_p10 = por %p114_p7, %p42_p0  ;;  %p626_p11 = por %p120_p8, %p48_p3 }
  0x15   : > { %s372_s6 = smul.u32 24, %s542_s22  ;;  %p635_p12 = pnand %p389_p9, %p44_p5 }
  0x16   : > { %s371_s7 = smul.u32 24, %s146_s5  ;;  %s147_s15 = scalar_lea.sflag [#allocation5], %s146_s5 }
  0x17   : > { %s155_s10 = scalar_lea.hbm %s704_s1, %s372_s6  ;;  %p448_p0 = pneg %p635_p12 }
  0x18   : > { %s156_s12 = sshll.u32 %s155_s10, 4  ;;  %s150_s13 = scalar_lea.vmem [#allocation4], %s371_s7  ;;  %s157_s12 = int_to_ptr.hbm [resolvable:$true] %s156_s12 }
  0x19   : > { %s158_s14 = sshll.u32 %s150_s13, 4  ;;  %s444_s16 = sshra.s32 %s157_s12, 4  ;;  %s159_s14 = int_to_ptr.vmem [resolvable:$true] %s158_s14  ;;  %s445_s16 = int_to_ptr.hbm [resolvable:$true] %s444_s16 }
  0x1a   : > { %s446_s17 = scalar_lea.hbm %s445_s16, 24  ;;  %s451_s25 = scalar_lea.hbm %s704_s1, 72 }
  0x1b   : > { %p447_p13 = scmp.ne.s32.totalorder %s445_s16, %s446_s17  ;;  %p452_p3 = scmp.lt.s32.totalorder %s445_s16, %s704_s1 }
  0x1c   : > { %p453_p4 = scmp.lt.s32.totalorder %s451_s25, %s446_s17 }
  0x1d   : > { %p449_p1 = pnand %p448_p0, %p447_p13 }
  0x1e   : > { %p454_p5 = por %p453_p4, %p452_p3 }
  0x1f   : > { %p450_p2 = pneg %p449_p1 }
  0x21   : > { %p455_p7 = pnand %p454_p5, %p450_p2 }
  0x23   : > { %458 = shalt.err (!%p455_p7)
}
  0x24   : > { %s545_s5 = smov 128   ;;  %s546_s7 = smov 8  }
  0x25   : > { %384 = dma.hbm_to_vmem [thread:$0]  (!%p635_p12), %s157_s12, 384, %s159_s14, %s147_s15, %s545_s5, %s545_s5, %s546_s7  }
  0x26   : > { %p367_p8 = scmp.ge.s32.totalorder %s542_s22, 1  ;;  %p166_p9 = scmp.lt.s32.totalorder %s542_s22, 4 }
  0x28   : > { %p167_p13 = pnand %p367_p8, %p166_p9 }
  0x29   : > { %s652_s8 = sand.u32 (!%p167_p13), 1, %s534_s20  }
  0x2a   : > { %170 = sbr.rel (%p167_p13) target bundleno = 167 (0xa7), region = 32  ;;  %s173_s10 = scalar_lea.sflag (!%p167_p13), [#allocation5], %s652_s8 }
  0x2b   : > { %s373_s9 = smul.u32 (!%p167_p13), 24, %s652_s8 }
  0x2d   : > { %s176_s13 = scalar_lea.vmem (!%p167_p13), [#allocation4], %s373_s9 }
  0x2f   : > { %521 = dma.done.wait (%p616_p6), %s173_s10, 384  }
  0x30   : > { %523 = vsyncadd (%p616_p6), %s173_s10, 4294966912  ;;  %s200_s11 = sld [smem:[#allocation3 + %s598_s0]]  ;;  %v218_v11 = vld [vmem:[%s176_s13] sm:$0xff]  ;;  %v219_v12 = vld [vmem:[%s176_s13 + $0x8] sm:$0xff]  ;;  %s376_s16 = smul.u32 24, %s598_s0 }
  0x31   : > { %v229_v13 = vmul.f32 %v218_v11, %v218_v11  ;;  %v230_v14 = vmul.f32 %v219_v12, %v219_v12  ;;  %v220_v15 = vld [vmem:[%s176_s13 + $0x10] sm:$0xff]  ;;  %v221_v16 = vadd.f32 %v219_v12, %v218_v11  ;;  %v256_v45 = vld [vmem:[%s705_s2] sm:$0x1]  ;;  %s199_s6 = scalar_lea.vmem [#allocation7], %s373_s9  ;;  %s275_s7 = scalar_lea.sflag [#allocation6], %s652_s8 }
  0x32   : > { %v231_v17 = vmul.f32 %v220_v15, %v220_v15  ;;  %v258_v48 = vld [vmem:[%s706_s3] sm:$0x1]  ;;  %s286_s26 = scalar_lea.hbm %s707_s4, %s376_s16  ;;  %s287_s0 = sshll.u32 %s199_s6, 4  ;;  %s288_s0 = int_to_ptr.vmem [resolvable:$true] %s287_s0 }
  0x33   : > { %v232_v18 = vadd.f32 %v230_v14, %v229_v13  ;;  %v222_v19 = vadd.f32 %v221_v16, %v220_v15  ;;  %s289_s5 = sshll.u32 %s286_s26, 4  ;;  %s290_s5 = int_to_ptr.hbm [resolvable:$true] %s289_s5 }
  0x34   : > { %s488_s10 = sshra.s32 %s290_s5, 4  ;;  %s489_s10 = int_to_ptr.hbm [resolvable:$true] %s488_s10 }
  0x35   : > { %v233_v20 = vadd.f32 %v232_v18, %v231_v17  ;;  %v223_v21 = vrot.slane %v222_v19, 4  ;;  %s490_s13 = scalar_lea.hbm %s489_s10, 24  ;;  %p495_p1 = scmp.lt.s32.totalorder %s489_s10, %s707_s4 }
  0x36   : > { %s201_s12 = scvt.s32.f32 %s200_s11  ;;  %p491_p6 = scmp.ne.s32.totalorder %s489_s10, %s490_s13 }
  0x37   : > { %v234_v22 = vrot.slane %v233_v20, 4  ;;  %v224_v23 = vadd.f32 %v223_v21, %v222_v19 }
  0x38   : > { %v202_v0 = vstv %s201_s12  ;;  %p492_p12 = pnand %p491_p6, %p622_p10  ;;  %s494_s12 = scalar_lea.hbm %s707_s4, 72 }
  0x39   : > { %428 = vrcp.f32 %v202_v0  ;;  %v214_v3 = vand.u32 2147483648, %v202_v0  ;;  %vm208_vm0 = vweird.f32 %v202_v0  ;;  %v212_v5 = vand.u32 2147483647, %v202_v0  ;;  %p496_p2 = scmp.lt.s32.totalorder %s494_s12, %s490_s13 }
  0x3a   : > { %v235_v24 = vadd.f32 %v234_v22, %v233_v20  ;;  %v225_v25 = vrot.slane %v224_v23, 2  ;;  %p493_p0 = pneg %p492_p12 }
  0x3b   : > { %v215_v7 = vor.u32 1.1754944e-38, %v214_v3  ;;  %vm213_vm3 = vcmp.eq.f32.partialorder %v212_v5, 8.507059e+37  ;;  %p497_p3 = por %p496_p2, %p495_p1 }
  0x3c   : > { %v236_v26 = vrot.slane %v235_v24, 2  ;;  %v226_v27 = vadd.f32 %v225_v25, %v224_v23 }
  0x3d   : > { %p498_p4 = pnand %p497_p3, %p493_p0 }
  0x3e   : > { %v237_v28 = vadd.f32 %v236_v26, %v235_v24  ;;  %v227_v29 = vrot.slane %v226_v27, 1 }
  0x3f   : > { %v429_v1 = vpop.eup %428 }
  0x40   : > { %v204_v2 = vmul.f32 %v429_v1, %v202_v0  ;;  %vm209_vm1 = vweird.f32 %v429_v1  ;;  %v238_v30 = vrot.slane %v237_v28, 1  ;;  %v228_v31 = vadd.f32 %v227_v29, %v226_v27 }
  0x41   : > { %vm210_vm2 = vmor %vm208_vm0, %vm209_vm1 }
  0x42   : > { %v205_v4 = vsub.f32 1.0, %v204_v2  ;;  %v239_v32 = vadd.f32 %v238_v30, %v237_v28 }
  0x44   : > { %v206_v6 = vmul.f32 %v429_v1, %v205_v4 }
  0x46   : > { %v207_v8 = vadd.f32 %v429_v1, %v206_v6 }
  0x48   : > { %v211_v9 = vsel %vm210_vm2, %v429_v1, %v207_v8 }
  0x49   : > { %v216_v10 = vsel %vm213_vm3, %v215_v7, %v211_v9 }
  0x4a   : > { %374 = vpush %v216_v10 }
  0x7b   : > { %s375_s28 = spop %374 }
  0x7c   : > { %v240_v33 = vstv %s375_s28 }
  0x7d   : > { %v241_v34 = vmul.f32 %v240_v33, %v228_v31  ;;  %v242_v35 = vmul.f32 %v240_v33, %v239_v32 }
  0x7f   : > { %v243_v36 = vmul.f32 %v241_v34, %v241_v34 }
  0x81   : > { %v244_v37 = vsub.f32 %v242_v35, %v243_v36 }
  0x83   : > { %v245_v38 = vadd.f32 1e-05, %v244_v37 }
  0x85   : > { %430 = vrsqrt.f32 %v245_v38  ;;  %vm252_vm5 = vweird.f32 %v245_v38 }
  0x8b   : > { %v431_v39 = vpop.eup %430 }
  0x8c   : > { %v247_v40 = vmul.f32 %v431_v39, %v245_v38  ;;  %vm253_vm4 = vweird.f32 %v431_v39 }
  0x8d   : > { %vm254_vm6 = vmor %vm252_vm5, %vm253_vm4 }
  0x8e   : > { %v248_v41 = vmul.f32 %v431_v39, %v247_v40 }
  0x90   : > { %v249_v42 = vmul.f32 0.5, %v248_v41 }
  0x92   : > { %v250_v43 = vsub.f32 1.5, %v249_v42 }
  0x94   : > { %v251_v44 = vmul.f32 %v431_v39, %v250_v43 }
  0x96   : > { %v255_v46 = vsel %vm254_vm6, %v431_v39, %v251_v44 }
  0x97   : > { %v257_v47 = vmul.f32 %v256_v45, %v255_v46 }
  0x99   : > { %v259_v49 = vmul.f32 %v257_v47, %v241_v34  ;;  %v261_v50 = vperm.slane %v257_v47, 0 }
  0x9b   : > { %v260_v51 = vsub.f32 %v258_v48, %v259_v49  ;;  %v262_v52 = vmul.f32 %v261_v50, %v218_v11  ;;  %v263_v53 = vmul.f32 %v261_v50, %v219_v12  ;;  %v264_v54 = vmul.f32 %v261_v50, %v220_v15 }
  0x9d   : > { %v266_v55 = vperm.slane %v260_v51, 0 }
  0x9f   : > { %v268_v56 = vadd.f32 %v266_v55, %v262_v52  ;;  %v269_v57 = vadd.f32 %v266_v55, %v263_v53  ;;  %v270_v58 = vadd.f32 %v266_v55, %v264_v54 }
  0xa1   : > { %271 = vst [vmem:[%s199_s6] sm:$0xff] %v268_v56 }
  0xa2   : > { %272 = vst [vmem:[%s199_s6 + $0x8] sm:$0xff] %v269_v57 }
  0xa3   : > { %273 = vst [vmem:[%s199_s6 + $0x10] sm:$0xff] %v270_v58 }
  0xa4   : > { %501 = shalt.err (!%p498_p4)
}
  0xa5   : > { %s547_s8 = smov 128   ;;  %s548_s15 = smov 8  }
  0xa6   : > { %379 = dma.vmem_to_hbm [thread:$0]  (%p622_p10), %s288_s0, 384, %s290_s5, %s275_s7, %s547_s8, %s547_s8, %s548_s15  }
  0xa7 PF: > { %p390_p5 = scmp.ge.s32.totalorder %s542_s22, 2  ;;  %s304_s16 = sand.u32 1, %s530_s19  }
  0xa8   : > { %s305_s17 = scalar_lea.sflag [#allocation6], %s304_s16 }
  0xa9   : > { %p386_p7 = pnand %p390_p5, %p626_p11 }
  0xab   : > { %p387_p8 = pneg %p386_p7 }
  0xad   : > { %525 = dma.done.wait (%p387_p8), %s305_s17, 384  }
  0xae   : > { %527 = vsyncadd (%p387_p8), %s305_s17, 4294966912  ;;  %p25_p9 = scmp.ge.s32.totalorder %s602_s24, 5   ;;  %s712_s19 = smov %s534_s20 }
  0xaf   : > { %s713_s20 = smov %s538_s21  ;;  %s714_s21 = smov %s614_s27 }
  0xb0   : > { %s715_s22 = smov %s602_s24  ;;  %27 = sbr.rel (!%p25_p9) target bundleno = 11 (0xb), region = 77 }
  0xb5   :  { %311 = vsyncpa [#allocation5], 1 }
  0xb6   :  { %313 = vsyncpa [#allocation5 + $0x1], 1 }
  0xb7   :  { %314 = vsyncpa [#allocation6], 1 }
  0xb8   :  { %316 = vsyncpa [#allocation6 + $0x1], 1 }

</bundles_post_ra>
